<compile_context>
chip_gen: v5e
topology: v5e:2x2
jax: 0.10.0
libtpu: 0.0.40
codegen_flags: <defaults>
</compile_context>

<pallas_src>
import functools
import math

import jax
import jax.numpy as jnp
from jax import lax
from jax.experimental import pallas as pl
from jax.experimental.pallas import tpu as pltpu

_MASK_VALUE = -0.7 * float(jnp.finfo(jnp.float32).max)


def _round_up(n, m):
    return ((n + m - 1) // m) * m


def _choose_seq_tile(n):
    """Sequence tile: single 8-aligned tile for small N, else 256 (or 128 if it pads less)."""
    if n <= 256:
        return _round_up(n, 8)
    pad256 = _round_up(n, 256) - n
    pad128 = _round_up(n, 128) - n
    return 128 if pad128 < pad256 else 256


# ---------------------------------------------------------------------------
# QKV projection kernel: x_tile @ w_qkv[h]  ->  head-major q/k/v tiles.
# Grid (B, seq_tiles, H); H innermost so the x tile is DMA'd once per (b, s).
# ---------------------------------------------------------------------------
def _qkv_proj_kernel(x_ref, w_ref, q_ref, k_ref, v_ref, *, dh):
    qkv = jnp.dot(x_ref[...], w_ref[...],
                  preferred_element_type=jnp.float32)          # (ts, 3*dh)
    q_ref[...] = qkv[:, :dh].astype(q_ref.dtype)               # scale pre-folded into w_q
    k_ref[...] = qkv[:, dh:2 * dh].astype(k_ref.dtype)
    v_ref[...] = qkv[:, 2 * dh:].astype(v_ref.dtype)


# ---------------------------------------------------------------------------
# Flash-attention kernel with fused per-head output projection.
# Grid (B, q_tiles, H, kv_tiles).
# ---------------------------------------------------------------------------
def _flash_attn_kernel(q_ref, k_ref, v_ref, wo_ref, bo_ref, out_ref,
                       m_s, l_s, acc_s, oacc_s,
                       *, kv_len, tkv, need_mask, approx_recip):
    h = pl.program_id(2)
    kv = pl.program_id(3)
    last_h = pl.num_programs(2) - 1
    last_kv = pl.num_programs(3) - 1

    # First step of this (b, q-tile): init the output-projection accumulator
    # with the bias (bias add folded into the init, nothing added at the end).
    @pl.when(jnp.logical_and(h == 0, kv == 0))
    def _():
        oacc_s[...] = bo_ref[...] + jnp.zeros_like(oacc_s)

    # Per-head online-softmax state reset.
    @pl.when(kv == 0)
    def _():
        m_s[...] = jnp.full(m_s.shape, -jnp.inf, dtype=m_s.dtype)
        l_s[...] = jnp.zeros_like(l_s)
        acc_s[...] = jnp.zeros_like(acc_s)

    # s = (q * scale) @ k^T : bf16 (compute dtype) operands, f32 accumulation.
    s = lax.dot_general(q_ref[...], k_ref[...], (((1,), (1,)), ((), ())),
                        preferred_element_type=jnp.float32)     # (tq, tkv)
    if need_mask:
        col = kv * tkv + lax.broadcasted_iota(jnp.int32, s.shape, 1)
        s = jnp.where(col < kv_len, s, _MASK_VALUE)

    # Online (numerically stable) softmax update in f32.
    m_new = jnp.maximum(m_s[...], jnp.max(s, axis=-1, keepdims=True))
    alpha = jnp.exp(m_s[...] - m_new)
    p = jnp.exp(s - m_new)
    l_s[...] = alpha * l_s[...] + jnp.sum(p, axis=-1, keepdims=True)
    acc_s[...] = alpha * acc_s[...] + jnp.dot(
        p.astype(v_ref.dtype), v_ref[...], preferred_element_type=jnp.float32)
    m_s[...] = m_new

    # End of the kv loop for this head: normalize (EUP reciprocal) and fold the
    # head into the output-projection accumulator.
    @pl.when(kv == last_kv)
    def _():
        o_h = acc_s[...] * pl.reciprocal(l_s[...], approx=approx_recip)
        oacc_s[...] += jnp.dot(o_h.astype(wo_ref.dtype), wo_ref[...],
                               preferred_element_type=jnp.float32)

    # Very last step: write the lane-dense (tq, D) output tile once.
    @pl.when(jnp.logical_and(h == last_h, kv == last_kv))
    def _():
        out_ref[...] = oacc_s[...].astype(out_ref.dtype)


# ---------------------------------------------------------------------------
# Optional debug kernel (attn / dot_qk). Tiled over q: only a (tq, N) slab of
# the score matrix lives in VMEM. Off the hot path (return_attn=False default).
# ---------------------------------------------------------------------------
def _attn_probs_kernel(q_ref, k_ref, attn_ref, dots_ref, *, kv_len, need_mask):
    dots = lax.dot_general(q_ref[...], k_ref[...], (((1,), (1,)), ((), ())),
                           preferred_element_type=jnp.float32)   # (tq, N_pad)
    dots_ref[...] = dots.astype(dots_ref.dtype)
    if need_mask:
        col = lax.broadcasted_iota(jnp.int32, dots.shape, 1)
        dots = jnp.where(col < kv_len, dots, _MASK_VALUE)
    m = jnp.max(dots, axis=-1, keepdims=True)
    e = jnp.exp(dots - m)
    attn_ref[...] = (e / jnp.sum(e, axis=-1, keepdims=True)).astype(attn_ref.dtype)


# ---------------------------------------------------------------------------
# Host wrapper.
# ---------------------------------------------------------------------------
def attention_forward(x, w_qkv, w_out, b_out, *, heads,
                      return_attn=False, compute_dtype=jnp.bfloat16):
    """Pallas forward matching the PyTorch module (mask=None, eval mode).

    Returns (out, {'attn': attn, 'dot_qk': dots}); attn/dots are None unless
    return_attn=True.
    """
    if x.ndim == 2:                       # mirror the PyTorch unsqueeze(0)
        x = x[None]
    B, N, D = x.shape
    inner = w_qkv.shape[1] // 3
    dh = inner // heads
    scale = dh ** (-0.5)
    cdt = jnp.dtype(compute_dtype)
    approx_recip = cdt != jnp.dtype(jnp.float32)

    # Head-major weights, softmax scale folded into w_q (host-side, one-time).
    w_r = w_qkv.reshape(D, 3, heads, dh)
    w_q = jnp.transpose(w_r[:, 0] * scale, (1, 0, 2))            # (H, D, dh)
    w_k = jnp.transpose(w_r[:, 1], (1, 0, 2))                    # (H, D, dh)
    w_v = jnp.transpose(w_r[:, 2], (1, 0, 2))                    # (H, D, dh)
    w_qkv_h = jnp.concatenate([w_q, w_k, w_v], axis=-1).astype(cdt)  # (H, D, 3*dh)
    w_o = w_out.reshape(heads, dh, D).astype(cdt)                # (H, dh, D)
    b_o = b_out.reshape(1, D).astype(jnp.float32)

    # Sequence tiling + padding (no full-N fallback for large ragged N).
    tile = _choose_seq_tile(N)
    N_pad = _round_up(N, tile)
    # Keep >= 2 'parallel' blocks so both v7x TensorCores get work when possible.
    if B * (N_pad // tile) < 2 and tile % 16 == 0:
        tile //= 2
    ns = N_pad // tile
    need_mask = N_pad != N

    x_p = x if not need_mask else jnp.pad(x, ((0, 0), (0, N_pad - N), (0, 0)))
    x_p = x_p.astype(cdt)

    # ---- Q/K/V projection: computed once, head-major, compute-dtype storage ----
    q, k, v = pl.pallas_call(
        functools.partial(_qkv_proj_kernel, dh=dh),
        out_shape=tuple(jax.ShapeDtypeStruct((B, heads, N_pad, dh), cdt)
                        for _ in range(3)),
        grid=(B, ns, heads),
        in_specs=[
            pl.BlockSpec((None, tile, D), lambda b, s, h: (b, s, 0)),
            pl.BlockSpec((None, D, 3 * dh), lambda b, s, h: (h, 0, 0)),
        ],
        out_specs=tuple(
            pl.BlockSpec((None, None, tile, dh), lambda b, s, h: (b, h, s, 0))
            for _ in range(3)),
        compiler_params=pltpu.CompilerParams(
            dimension_semantics=("parallel", "parallel", "arbitrary")),
    )(x_p, w_qkv_h)

    # ---- flash attention + fused output projection ----
    flops = int(B * heads * (4 * N_pad * N_pad * dh + 2 * N_pad * dh * D))
    bytes_accessed = int(
        B * heads * N_pad * dh * cdt.itemsize * (1 + 2 * ns)  # q once, k/v per q-tile
        + heads * dh * D * cdt.itemsize + D * 4
        + B * N_pad * D * x.dtype.itemsize)
    cost = pl.CostEstimate(flops=flops,
                           transcendentals=int(B * heads * N_pad * N_pad),
                           bytes_accessed=bytes_accessed)

    out_p = pl.pallas_call(
        functools.partial(_flash_attn_kernel, kv_len=N, tkv=tile,
                          need_mask=need_mask, approx_recip=approx_recip),
        out_shape=jax.ShapeDtypeStruct((B, N_pad, D), x.dtype),
        grid=(B, ns, heads, ns),
        in_specs=[
            pl.BlockSpec((None, None, tile, dh), lambda b, qi, h, ki: (b, h, qi, 0)),  # q
            pl.BlockSpec((None, None, tile, dh), lambda b, qi, h, ki: (b, h, ki, 0)),  # k
            pl.BlockSpec((None, None, tile, dh), lambda b, qi, h, ki: (b, h, ki, 0)),  # v
            pl.BlockSpec((None, dh, D), lambda b, qi, h, ki: (h, 0, 0)),               # w_o
            pl.BlockSpec((1, D), lambda b, qi, h, ki: (0, 0)),                          # b_o
        ],
        out_specs=pl.BlockSpec((None, tile, D), lambda b, qi, h, ki: (b, qi, 0)),
        scratch_shapes=[
            pltpu.VMEM((tile, 1), jnp.float32),   # running max
            pltpu.VMEM((tile, 1), jnp.float32),   # running denominator
            pltpu.VMEM((tile, dh), jnp.float32),  # per-head attn @ v accumulator
            pltpu.VMEM((tile, D), jnp.float32),   # cross-head output-proj accumulator
        ],
        compiler_params=pltpu.CompilerParams(
            dimension_semantics=("parallel", "parallel", "arbitrary", "arbitrary"),
            vmem_limit_bytes=48 * 1024 * 1024),
        cost_estimate=cost,
    )(q, k, v, w_o, b_o)
    out = out_p[:, :N, :] if need_mask else out_p

    attn = dots = None
    if return_attn:
        attn_p, dots_p = pl.pallas_call(
            functools.partial(_attn_probs_kernel, kv_len=N, need_mask=need_mask),
            out_shape=(jax.ShapeDtypeStruct((B, heads, N_pad, N_pad), x.dtype),
                       jax.ShapeDtypeStruct((B, heads, N_pad, N_pad), x.dtype)),
            grid=(B, heads, ns),
            in_specs=[
                pl.BlockSpec((None, None, tile, dh), lambda b, h, qi: (b, h, qi, 0)),
                pl.BlockSpec((None, None, N_pad, dh), lambda b, h, qi: (b, h, 0, 0)),
            ],
            out_specs=(
                pl.BlockSpec((None, None, tile, N_pad), lambda b, h, qi: (b, h, qi, 0)),
                pl.BlockSpec((None, None, tile, N_pad), lambda b, h, qi: (b, h, qi, 0)),
            ),
            compiler_params=pltpu.CompilerParams(
                dimension_semantics=("parallel", "parallel", "parallel"),
                vmem_limit_bytes=48 * 1024 * 1024),
        )(q, k)
        attn = attn_p[:, :, :N, :N] if need_mask else attn_p
        dots = dots_p[:, :, :N, :N] if need_mask else dots_p

    return out, {'attn': attn, 'dot_qk': dots}


# ---------------------------------------------------------------------------
# Pure-JAX reference matching the PyTorch forward (mask=None, eval mode).
# ---------------------------------------------------------------------------
def attention_reference(x, w_qkv, w_out, b_out, *, heads):
    if x.ndim == 2:
        x = x[None]
    B, N, D = x.shape
    inner = w_qkv.shape[1] // 3
    dh = inner // heads
    scale = dh ** (-0.5)

    qkv = x @ w_qkv
    q, k, v = jnp.split(qkv, 3, axis=-1)

    def to_heads(t):                                   # 'b n (h d) -> b h n d'
        return t.reshape(B, N, heads, dh).transpose(0, 2, 1, 3)

    q, k, v = map(to_heads, (q, k, v))
    dots = jnp.einsum('bhid,bhjd->bhij', q, k) * scale
    attn = jax.nn.softmax(dots, axis=-1)
    o = jnp.einsum('bhij,bhjd->bhid', attn, v)
    o = o.transpose(0, 2, 1, 3).reshape(B, N, inner)
    out = o @ w_out + b_out.reshape(1, D)
    return out, attn, dots


if __name__ == "__main__":
    B, N, DIM = 2, 8, 32
    HEADS, DIM_HEAD = 4, 8
    INNER = HEADS * DIM_HEAD

    key = jax.random.PRNGKey(0)
    kx, kq, ko, kb = jax.random.split(key, 4)

    x = jax.random.normal(kx, (B, N, DIM), dtype=jnp.float32)
    lim_qkv = 1.0 / math.sqrt(DIM)
    lim_out = 1.0 / math.sqrt(INNER)
    w_qkv = jax.random.uniform(kq, (DIM, 3 * INNER), jnp.float32, -lim_qkv, lim_qkv)
    w_out = jax.random.uniform(ko, (INNER, DIM), jnp.float32, -lim_out, lim_out)
    b_out = jax.random.uniform(kb, (1, DIM), jnp.float32, -lim_out, lim_out)

    ref_out, ref_attn, ref_dots = attention_reference(
        x, w_qkv, w_out, b_out, heads=HEADS)

    # 1) Optimized default path: bf16 MXU operands, f32 accumulation.
    out_bf16, _ = attention_forward(x, w_qkv, w_out, b_out, heads=HEADS)
    jax.block_until_ready(out_bf16)
    assert jnp.allclose(out_bf16, ref_out, atol=5e-2, rtol=5e-2), \
        float(jnp.max(jnp.abs(out_bf16 - ref_out)))

    # 2) f32 compute path with the (opt-in) debug outputs: tight check.
    out_f32, aux = attention_forward(x, w_qkv, w_out, b_out, heads=HEADS,
                                     return_attn=True, compute_dtype=jnp.float32)
    jax.block_until_ready(out_f32)
    jax.block_until_ready(aux['attn'])
    assert jnp.allclose(out_f32, ref_out, atol=1e-4, rtol=1e-4), \
        float(jnp.max(jnp.abs(out_f32 - ref_out)))
    assert jnp.allclose(aux['attn'], ref_attn, atol=1e-4, rtol=1e-4)
    assert jnp.allclose(aux['dot_qk'], ref_dots, atol=1e-4, rtol=1e-4)

    # 3) Ragged sequence length (exercises the kv-padding mask path).
    N2 = 12
    x2 = jax.random.normal(jax.random.PRNGKey(1), (B, N2, DIM), dtype=jnp.float32)
    out2, _ = attention_forward(x2, w_qkv, w_out, b_out, heads=HEADS,
                                compute_dtype=jnp.float32)
    ref2, _, _ = attention_reference(x2, w_qkv, w_out, b_out, heads=HEADS)
    jax.block_until_ready(out2)
    assert jnp.allclose(out2, ref2, atol=1e-4, rtol=1e-4), \
        float(jnp.max(jnp.abs(out2 - ref2)))

    print("KERNEL_OK")
</pallas_src>

<mosaic_0001>
module attributes {stable_mosaic.version = 11 : i64} {
  func.func @_qkv_proj_kernel(%arg0: i32, %arg1: i32, %arg2: i32, %arg3: memref<1x8x32xbf16, #tpu.memory_space<vmem>>, %arg4: memref<1x32x24xbf16, #tpu.memory_space<vmem>>, %arg5: memref<1x1x8x8xbf16, #tpu.memory_space<vmem>>, %arg6: memref<1x1x8x8xbf16, #tpu.memory_space<vmem>>, %arg7: memref<1x1x8x8xbf16, #tpu.memory_space<vmem>>) attributes {dimension_semantics = [#tpu.dimension_semantics<parallel>, #tpu.dimension_semantics<parallel>, #tpu.dimension_semantics<arbitrary>], iteration_bounds = array<i64: 2, 1, 4>, scalar_prefetch = 0 : i64, scratch_operands = 0 : i64, tpu.core_type = #tpu.core_type<tc>, window_params = [{transform_indices = @transform_0, window_bounds = array<i64: 1, 8, 32>}, {transform_indices = @transform_1, window_bounds = array<i64: 1, 32, 24>}, {transform_indices = @transform_2, window_bounds = array<i64: 1, 1, 8, 8>}, {transform_indices = @transform_3, window_bounds = array<i64: 1, 1, 8, 8>}, {transform_indices = @transform_4, window_bounds = array<i64: 1, 1, 8, 8>}]} {
    %c0 = arith.constant 0 : index
    %c0_0 = arith.constant 0 : index
    %c0_1 = arith.constant 0 : index
    %0 = vector.load %arg3[%c0, %c0_0, %c0_1] : memref<1x8x32xbf16, #tpu.memory_space<vmem>>, vector<1x8x32xbf16>
    %1 = vector.shape_cast %0 : vector<1x8x32xbf16> to vector<8x32xbf16>
    %c0_2 = arith.constant 0 : index
    %c0_3 = arith.constant 0 : index
    %c0_4 = arith.constant 0 : index
    %2 = vector.load %arg4[%c0_2, %c0_3, %c0_4] : memref<1x32x24xbf16, #tpu.memory_space<vmem>>, vector<1x32x24xbf16>
    %3 = vector.shape_cast %2 : vector<1x32x24xbf16> to vector<32x24xbf16>
    %cst = arith.constant dense<0.000000e+00> : vector<8x24xf32>
    %4 = tpu.matmul %1, %3, %cst {dimension_numbers = #tpu.dot_dimension_numbers<[1], [0], [0], [1], [0, 0, 1, 1], [], []>} : vector<8x32xbf16>, vector<32x24xbf16>, vector<8x24xf32> -> vector<8x24xf32>
    %5 = vector.extract_strided_slice %4 {offsets = [0, 0], sizes = [8, 8], strides = [1, 1]} : vector<8x24xf32> to vector<8x8xf32>
    %6 = arith.truncf %5 : vector<8x8xf32> to vector<8x8xbf16>
    %c0_5 = arith.constant 0 : index
    %c0_6 = arith.constant 0 : index
    %c0_7 = arith.constant 0 : index
    %c0_8 = arith.constant 0 : index
    %7 = vector.load %arg5[%c0_5, %c0_6, %c0_7, %c0_8] : memref<1x1x8x8xbf16, #tpu.memory_space<vmem>>, vector<1x1x8x8xbf16>
    %8 = vector.shape_cast %7 : vector<1x1x8x8xbf16> to vector<8x8xbf16>
    %9 = vector.shape_cast %6 : vector<8x8xbf16> to vector<1x1x8x8xbf16>
    tpu.vector_store %arg5[%c0_5, %c0_6, %c0_7, %c0_8], %9 {strides = array<i32>} : memref<1x1x8x8xbf16, #tpu.memory_space<vmem>>, vector<1x1x8x8xbf16>,
    %10 = vector.extract_strided_slice %4 {offsets = [0, 8], sizes = [8, 8], strides = [1, 1]} : vector<8x24xf32> to vector<8x8xf32>
    %11 = arith.truncf %10 : vector<8x8xf32> to vector<8x8xbf16>
    %c0_9 = arith.constant 0 : index
    %c0_10 = arith.constant 0 : index
    %c0_11 = arith.constant 0 : index
    %c0_12 = arith.constant 0 : index
    %12 = vector.load %arg6[%c0_9, %c0_10, %c0_11, %c0_12] : memref<1x1x8x8xbf16, #tpu.memory_space<vmem>>, vector<1x1x8x8xbf16>
    %13 = vector.shape_cast %12 : vector<1x1x8x8xbf16> to vector<8x8xbf16>
    %14 = vector.shape_cast %11 : vector<8x8xbf16> to vector<1x1x8x8xbf16>
    tpu.vector_store %arg6[%c0_9, %c0_10, %c0_11, %c0_12], %14 {strides = array<i32>} : memref<1x1x8x8xbf16, #tpu.memory_space<vmem>>, vector<1x1x8x8xbf16>,
    %15 = vector.extract_strided_slice %4 {offsets = [0, 16], sizes = [8, 8], strides = [1, 1]} : vector<8x24xf32> to vector<8x8xf32>
    %16 = arith.truncf %15 : vector<8x8xf32> to vector<8x8xbf16>
    %c0_13 = arith.constant 0 : index
    %c0_14 = arith.constant 0 : index
    %c0_15 = arith.constant 0 : index
    %c0_16 = arith.constant 0 : index
    %17 = vector.load %arg7[%c0_13, %c0_14, %c0_15, %c0_16] : memref<1x1x8x8xbf16, #tpu.memory_space<vmem>>, vector<1x1x8x8xbf16>
    %18 = vector.shape_cast %17 : vector<1x1x8x8xbf16> to vector<8x8xbf16>
    %19 = vector.shape_cast %16 : vector<8x8xbf16> to vector<1x1x8x8xbf16>
    tpu.vector_store %arg7[%c0_13, %c0_14, %c0_15, %c0_16], %19 {strides = array<i32>} : memref<1x1x8x8xbf16, #tpu.memory_space<vmem>>, vector<1x1x8x8xbf16>,
    return
  }
  func.func @transform_0(%arg0: i32, %arg1: i32, %arg2: i32) -> (i32, i32, i32) {
    %c0_i32 = arith.constant 0 : i32
    %c0_i32_0 = arith.constant 0 : i32
    return %arg0, %arg1, %c0_i32 : i32, i32, i32
  }
  func.func @transform_1(%arg0: i32, %arg1: i32, %arg2: i32) -> (i32, i32, i32) {
    %c0_i32 = arith.constant 0 : i32
    %c0_i32_0 = arith.constant 0 : i32
    %c0_i32_1 = arith.constant 0 : i32
    return %arg2, %c0_i32, %c0_i32_0 : i32, i32, i32
  }
  func.func @transform_2(%arg0: i32, %arg1: i32, %arg2: i32) -> (i32, i32, i32, i32) {
    %c0_i32 = arith.constant 0 : i32
    %c0_i32_0 = arith.constant 0 : i32
    return %arg0, %arg2, %arg1, %c0_i32 : i32, i32, i32, i32
  }
  func.func @transform_3(%arg0: i32, %arg1: i32, %arg2: i32) -> (i32, i32, i32, i32) {
    %c0_i32 = arith.constant 0 : i32
    %c0_i32_0 = arith.constant 0 : i32
    return %arg0, %arg2, %arg1, %c0_i32 : i32, i32, i32, i32
  }
  func.func @transform_4(%arg0: i32, %arg1: i32, %arg2: i32) -> (i32, i32, i32, i32) {
    %c0_i32 = arith.constant 0 : i32
    %c0_i32_0 = arith.constant 0 : i32
    return %arg0, %arg2, %arg1, %c0_i32 : i32, i32, i32, i32
  }
}

</mosaic_0001>

<bundles_post_ra>
// kernel: tpu_custom_call.1
= control target key start
LH: loop header
LB: loop body
LE: loop exit
PB: predicated region body
PF: predicated region fallthrough
CT: control target
= control target key end

     0   :  { %s1022_s0 = inlined_call_operand.vmem [shape: bf16[2,8,32], index: 0, kind: input, shape index: {}]   ;;  %s1023_s1 = inlined_call_operand.vmem [shape: bf16[4,32,24], index: 1, kind: input, shape index: {}]   ;;  %s1024_s2 = inlined_call_operand.hbm [shape: bf16[2,4,8,8], index: 2, kind: output, shape index: {0}]   ;;  %s1025_s3 = inlined_call_operand.hbm [shape: bf16[2,4,8,8], index: 3, kind: output, shape index: {1}]   ;;  %s1026_s4 = inlined_call_operand.hbm [shape: bf16[2,4,8,8], index: 4, kind: output, shape index: {2}]  }
   0x1   :  { %1029 = sst [smem:[#allocation9_spill]] %s1022_s0 }
   0x2   :  { %1030 = sst [smem:[#allocation10_spill]] %s1023_s1 }
   0x3   :  { %10 = vsyncpa [#allocation3], 0 }
   0x4   :  { %12 = vsyncpa [#allocation3 + $0x1], 0 }
   0x5   :  { %13 = vsyncpa [#allocation5], 0 }
   0x6   :  { %15 = vsyncpa [#allocation5 + $0x1], 0  ;;  %s843_s15 = smov 0   ;;  %s845_s16 = smov 0  }
   0x7   :  { %s847_s17 = smov 0   ;;  %s849_s18 = smov 0  }
   0x8   :  { %s851_s19 = smov 0   ;;  %s853_s20 = smov 0  }
   0x9   :  { %s855_s21 = smov 0   ;;  %s857_s22 = smov 0  }
   0xa LB: > { %s1028_s23 = sadd.s32 4294967295, %s814_s22   ;;  %s1027_s24 = sadd.s32 4294967294, %s814_s22   ;;  %s814_s22 = sphi %s857_s22, %s21_s22   ;;  %s810_s21 = sphi %s855_s21, %s1043_s21   ;;  %s806_s20 = sphi %s853_s20, %s1042_s20   ;;  %s802_s19 = sphi %s851_s19, %s1041_s19   ;;  %s798_s18 = sphi %s849_s18, %s1040_s18   ;;  %s794_s17 = sphi %s847_s17, %s1039_s17   ;;  %s790_s16 = sphi %s845_s16, %s1038_s16   ;;  %s786_s15 = sphi %s843_s15, %s1037_s15  }
   0xb   : > { %s33_s25 = sadd.s32 1, %s806_s20  ;;  %s40_s26 = sadd.s32 1, %s810_s21 }
   0xc   : > { %p34_p0 = scmp.ge.s32.totalorder %s33_s25, 4  ;;  %p115_p1 = scmp.ne.s32.totalorder %s794_s17, %s790_s16 }
   0xd   : > { %p116_p2 = scmp.eq.s32.totalorder %s1028_s23, 7  ;;  %p121_p5 = scmp.ne.s32.totalorder %s790_s16, %s786_s15 }
   0xe   : > { %s1045_s25 = smov (%p34_p0, %s33_s25), 0  ;;  %s1047_s26 = smov (!%p34_p0, %s40_s26), %s810_s21 }
   0xf   : > { %s99_s27 = ssub.s32 %s806_s20, %s1045_s25  ;;  %p896_p3 = por %p116_p2, %p115_p1 }
  0x10   : > { %p42_p4 = scmp.ge.s32.totalorder %s1047_s26, 2  ;;  %p122_p6 = scmp.eq.s32.totalorder %s1027_s24, 7 }
  0x11   : > { %p547_p7 = scmp.ge.s32.totalorder %s814_s22, 1  ;;  %p218_p9 = scmp.lt.s32.totalorder %s814_s22, 9 }
  0x12   : > { %s1049_s26 = smov (%p42_p4, %s1047_s26), 0  ;;  %p907_p8 = por %p122_p6, %p121_p5 }
  0x13   : > { %s98_s30 = ssub.s32 %s810_s21, %s1049_s26  ;;  %s105_s5 = sadd.s32 1, %s794_s17 }
  0x14   : > { %s100_s6 = sor.u32 %s99_s27, %s98_s30  ;;  %p219_p10 = pnand %p547_p7, %p218_p9 }
  0x15   : > { %p103_p11 = scmp.eq.s32.totalorder %s100_s6, 0  ;;  %p268_p12 = scmp.lt.s32.totalorder (!%p219_p10), %s798_s18, 3 }
  0x16   : > { %222 = sbr.rel (%p219_p10) target bundleno = 298 (0x12a), region = 28  ;;  %p261_p13 = scmp.lt.s32.totalorder (!%p219_p10), %s802_s19, 1 }
  0x17   : > { %s916_s7 = scalar_select %p103_p11, %s794_s17, %s105_s5  }
  0x18   : > { %s1033_s1 = sld [smem:[#allocation10_spill]] (!%p219_p10)  ;;  %s566_s6 = sshll.u32 (!%p219_p10), %s802_s19, 2 }
  0x19   : > { %s1034_s0 = sld [smem:[#allocation9_spill]] (!%p219_p10)  ;;  %s244_s24 = sand.u32 (!%p219_p10), 1, %s790_s16  }
  0x1a   : > { %s342_s23 = sadd.s32 (!%p219_p10), %s798_s18, %s566_s6  ;;  %s816_s27 = smov (!%p219_p10), 120  }
  0x1b   : > { %s269_s8 = scalar_select %p268_p12, %s798_s18, 3  ;;  %vm291_vm0 = vcmask 261120   ;;  %vm309_vm1 = vcmask 60416  }
  0x1c   : > { %s262_s9 = scalar_select %p261_p13, %s802_s19, 1 }
  0x1d   : > { %s574_s10 = sshll.u32 %s269_s8, 4  ;;  %s931_s8 = sshll.u32 %s244_s24, 2 }
  0x1e   : > { %s272_s13 = scalar_lea.vmem %s1033_s1, %s574_s10  ;;  %s551_s14 = sshll.u32 %s262_s9, 2 }
  0x1f   : > { %v576_v0 = vld [vmem:[%s272_s13 + $0x8] sm:$0xff]  ;;  %v575_v1 = vld [vmem:[%s272_s13] sm:$0xff]  ;;  %s267_s5 = scalar_lea.vmem %s1034_s0, %s551_s14  ;;  %s933_s11 = sshll.u32 %s342_s23, 2 }
  0x20   : > { %301 = vmatpush.bf16.msra.mxu0 %v576_v0  ;;  %v274_v2 = vld [vmem:[%s267_s5] sm:$0xf]  ;;  %s344_s12 = scalar_lea.hbm %s1024_s2, %s933_s11  ;;  %s246_s13 = scalar_lea.vmem [#allocation2], %s931_s8 }
  0x21   : > { %s346_s14 = sshll.u32 %s246_s13, 4  ;;  %s348_s19 = sshll.u32 %s344_s12, 4  ;;  %s347_s14 = int_to_ptr.vmem [resolvable:$true] %s346_s14  ;;  %s349_s19 = int_to_ptr.hbm [resolvable:$true] %s348_s19 }
  0x22   : > { %s321_s18 = scalar_lea.sflag [#allocation3], %s244_s24  ;;  %s674_s23 = sshra.s32 %s349_s19, 4  ;;  %s675_s23 = int_to_ptr.hbm [resolvable:$true] %s674_s23 }
  0x23   : > { %s676_s30 = scalar_lea.hbm %s675_s23, 4  ;;  %s680_s9 = scalar_lea.hbm %s1024_s2, 32 }
  0x24   : > { %302 = vmatpush.bf16.msra.mxu0 %v575_v1  ;;  %p677_p0 = scmp.ne.s32.totalorder %s675_s23, %s676_s30  ;;  %p681_p4 = scmp.lt.s32.totalorder %s675_s23, %s1024_s2 }
  0x25   : > { %p682_p5 = scmp.lt.s32.totalorder %s680_s9, %s676_s30 }
  0x26   : > { %p678_p1 = pnand %p677_p0, %p896_p3 }
  0x27   : > { %562 = vmatmul.msk.bf16.vlgmr.msra.gmra.mxu0 %vm291_vm0, %v274_v2  ;;  %p683_p6 = por %p682_p5, %p681_p4 }
  0x28   : > { %p679_p2 = pneg %p678_p1 }
  0x2a   : > { %p684_p7 = pnand %p683_p6, %p679_p2 }
  0xa4   : > { %v304_v3 = vpop.f32.mrf.mxu0 }
  0xa5   : > { %v308_v4 = vpack.c.bf16 %v304_v3, %v304_v3 }
  0xa7   : > { %312 = vrot.lane.b32.xlu0 %v308_v4, %s816_s27  ;;  %310 = vst.msk [vmem:[%s246_s13] sm:$0xf] %vm309_vm1, %v308_v4 }
  0xa8   : > { %687 = shalt.err (!%p684_p7)
}
  0xa9   : > { %577 = dma.vmem_to_hbm [thread:$0]  (%p896_p3), %s347_s14, 64, %s349_s19, %s321_s18  }
  0xaa   : > { %s817_s24 = smov 112   ;;  %s361_s0 = scalar_lea.hbm %s1025_s3, %s933_s11 }
  0xab   : > { %s1035_s27 = sadd.s32 4294967295, %s814_s22   ;;  %s253_s30 = scalar_lea.vmem [#allocation4], %s931_s8 }
  0xac   : > { %v306_v5 = vpop.f32.mrf.mxu0  ;;  %s957_s23 = sand.u32 1, %s1035_s27   ;;  %s363_s5 = sshll.u32 %s253_s30, 4  ;;  %s364_s5 = int_to_ptr.vmem [resolvable:$true] %s363_s5 }
  0xad   : > { %s365_s6 = sshll.u32 %s361_s0, 4  ;;  %s378_s18 = scalar_lea.hbm %s1026_s4, %s933_s11  ;;  %s366_s6 = int_to_ptr.hbm [resolvable:$true] %s365_s6 }
  0xae   : > { %s326_s9 = scalar_lea.sflag [#allocation5], %s957_s23  ;;  %s702_s10 = sshra.s32 %s366_s6, 4  ;;  %s703_s10 = int_to_ptr.hbm [resolvable:$true] %s702_s10 }
  0xaf   : > { %316 = vrot.lane.b32.xlu0 %v308_v4, %s817_s24  ;;  %s704_s24 = scalar_lea.hbm %s703_s10, 4  ;;  %s708_s0 = scalar_lea.hbm %s1025_s3, 32 }
  0xb0   : > { %p705_p9 = scmp.ne.s32.totalorder %s703_s10, %s704_s24  ;;  %p709_p12 = scmp.lt.s32.totalorder %s703_s10, %s1025_s3 }
  0xb1   : > { %p710_p13 = scmp.lt.s32.totalorder %s708_s0, %s704_s24 }
  0xb2   : > { %p706_p10 = pnand %p705_p9, %p896_p3 }
  0xb3   : > { %p711_p0 = por %p710_p13, %p709_p12 }
  0xb4   : > { %p707_p11 = pneg %p706_p10 }
  0xb6   : > { %p712_p1 = pnand %p711_p0, %p707_p11 }
 0x119   : > { %v313_v6 = vpop.permute.xlu0 %312 }
 0x11a   : > { %315 = vst.msk [vmem:[%s253_s30] sm:$0xf] %vm309_vm1, %v313_v6 }
 0x11b   : > { %715 = shalt.err (!%p712_p1)
}
 0x11c   : > { %578 = dma.vmem_to_hbm [thread:$0]  (%p896_p3), %s364_s5, 64, %s366_s6, %s326_s9  }
 0x11d   : > { %s260_s11 = scalar_lea.vmem [#allocation6], %s931_s8  ;;  %s382_s14 = sshll.u32 %s378_s18, 4  ;;  %s383_s14 = int_to_ptr.hbm [resolvable:$true] %s382_s14 }
 0x11e   : > { %s380_s30 = sshll.u32 %s260_s11, 4  ;;  %s730_s1 = sshra.s32 %s383_s14, 4  ;;  %s381_s30 = int_to_ptr.vmem [resolvable:$true] %s380_s30  ;;  %s731_s1 = int_to_ptr.hbm [resolvable:$true] %s730_s1 }
 0x11f   : > { %s732_s19 = scalar_lea.hbm %s731_s1, 4  ;;  %s736_s12 = scalar_lea.hbm %s1026_s4, 32 }
 0x120   : > { %p733_p2 = scmp.ne.s32.totalorder %s731_s1, %s732_s19  ;;  %p737_p6 = scmp.lt.s32.totalorder %s731_s1, %s1026_s4 }
 0x121   : > { %v317_v7 = vpop.permute.xlu0 %316  ;;  %p738_p7 = scmp.lt.s32.totalorder %s736_s12, %s732_s19 }
 0x122   : > { %319 = vst.msk [vmem:[%s260_s11] sm:$0xf] %vm309_vm1, %v317_v7  ;;  %p734_p4 = pnand %p733_p2, %p896_p3 }
 0x123   : > { %p739_p9 = por %p738_p7, %p737_p6 }
 0x124   : > { %p735_p5 = pneg %p734_p4 }
 0x126   : > { %p740_p10 = pnand %p739_p9, %p735_p5 }
 0x128   : > { %743 = shalt.err (!%p740_p10)
}
 0x129   : > { %579 = dma.vmem_to_hbm [thread:$0]  (%p896_p3), %s381_s30, 64, %s383_s14, %s326_s9  }
 0x12a PF: > { %p593_p11 = scmp.ge.s32.totalorder %s814_s22, 2  ;;  %s394_s6 = sand.u32 1, %s786_s15  }
 0x12b   : > { %s395_s18 = scalar_lea.sflag [#allocation3], %s394_s6 }
 0x12c   : > { %p584_p12 = pnand %p593_p11, %p907_p8 }
 0x12e   : > { %p585_p13 = pneg %p584_p12 }
 0x130   : > { %777 = dma.done.wait (%p585_p13), %s395_s18, 64  }
 0x131   : > { %779 = vsyncadd (%p585_p13), %s395_s18, 4294967232  ;;  %s1036_s13 = sadd.s32 4294967294, %s814_s22  }
 0x132   : > { %s404_s0 = sand.u32 1, %s1036_s13  }
 0x133   : > { %s405_s27 = scalar_lea.sflag [#allocation5], %s404_s0 }
 0x134   : > { %781 = dma.done.wait (%p585_p13), %s405_s27, 128  }
 0x135   : > { %783 = vsyncadd (%p585_p13), %s405_s27, 4294967168  ;;  %s21_s22 = sadd.s32 1, %s814_s22   ;;  %s1037_s15 = smov %s790_s16 }
 0x136   : > { %p18_p3 = scmp.ge.s32.totalorder %s21_s22, 10   ;;  %s1038_s16 = smov %s794_s17 }
 0x137   : > { %s1039_s17 = smov %s916_s7  ;;  %s1040_s18 = smov %s806_s20 }
 0x138   : > { %s1041_s19 = smov %s810_s21  ;;  %s1042_s20 = smov %s1045_s25 }
 0x139   : > { %s1043_s21 = smov %s1049_s26  ;;  %20 = sbr.rel (!%p18_p3) target bundleno = 10 (0xa), region = 98 }
 0x13e   :  { %421 = vsyncpa [#allocation3], 1 }
 0x13f   :  { %423 = vsyncpa [#allocation3 + $0x1], 1 }
 0x140   :  { %424 = vsyncpa [#allocation5], 1 }
 0x141   :  { %426 = vsyncpa [#allocation5 + $0x1], 1 }

</bundles_post_ra>
